<compile_context>
chip_gen: v7x
topology: tpu7x:2x2x1
jax: 0.10.0
libtpu: 0.0.40
codegen_flags: <defaults>
</compile_context>

<pallas_src>
import jax
import jax.numpy as jnp
from jax.experimental import pallas as pl
from jax.experimental.pallas import tpu as pltpu


def _upsample_kernel(x_ref, w_ref, b_ref, o_ref):
    # x_ref: (1, TILE_H, Wp, Cin)        input tile, NHWC (padded W / channels)
    # w_ref: (Cin, Cp)                   1x1 conv weight with BN scale folded in
    # b_ref: (1, Cp)                     folded BN bias (f32)
    # o_ref: (1, TILE_H, 2, 2*Wp, Cp)    nearest-upsampled tile, interleave-ready
    _, th, wd, cin = x_ref.shape
    cout = w_ref.shape[1]

    # 1x1 conv over channels == (TILE_H*Wp, Cin) @ (Cin, Cp) on the MXU.
    x = x_ref[0].reshape(th * wd, cin)
    y = jnp.dot(x, w_ref[...], preferred_element_type=jnp.float32)

    # Folded BatchNorm bias (scale already in the weights) + LeakyReLU(0.1).
    y = y + b_ref[...]
    y = jnp.where(y >= 0, y, jnp.float32(0.1) * y)
    y3 = y.reshape(th, wd, cout)                              # (TILE_H, Wp, Cp)

    # Nearest 2x upsample, fully vectorized:
    #   W-direction: sublane interleave (broadcast over a new size-2 axis and
    #                merge it into the W axis) -> rides the XLU slot,
    #   H-direction: broadcast over the size-2 major output dim.
    # Single dense, unmasked full-tile store (lane dim Cp is a 128-multiple).
    y_up = jnp.broadcast_to(y3[:, :, None, :], (th, wd, 2, cout))
    y_up = y_up.reshape(th, 2 * wd, cout).astype(o_ref.dtype)  # (TILE_H, 2Wp, Cp)
    o_ref[0] = jnp.broadcast_to(y_up[:, None, :, :], (th, 2, 2 * wd, cout))


def _round_up(x, m):
    return ((x + m - 1) // m) * m


def _vmem_capacity_bytes():
    """Per-core VMEM capacity, with a conservative fallback (v7x-sized)."""
    try:
        info = pltpu.get_tpu_info()
        cap = getattr(info, "vmem_capacity_bytes", None)
        if cap:
            return int(cap)
    except Exception:
        pass
    return 64 * 1024 * 1024


def _pick_tile_h(h, n, w_p, cin, cout_p, in_bytes, out_bytes,
                 vmem_budget_bytes, max_tile_h=None, min_grid_steps=8):
    """Largest H-tile whose resident blocks fit the budget, with enough grid steps."""
    per_h = (2 * w_p * cin * in_bytes                # double-buffered input block
             + 2 * 4 * w_p * cout_p * out_bytes      # double-buffered (2x2W) output block
             + 3 * w_p * cout_p * 4)                 # f32 matmul acc + upsample temps
    tile = max(1, min(h, vmem_budget_bytes // max(per_h, 1)))
    if max_tile_h is not None:
        tile = max(1, min(tile, max_tile_h))
    # Keep >= min_grid_steps programs so megacore sharding + the double-buffered
    # pipeline actually have work to overlap (a maximal tile can collapse the grid).
    while tile > 1 and n * pl.cdiv(h, tile) < min_grid_steps:
        tile = pl.cdiv(tile, 2)
    return int(tile)


def upsample_forward_nhwc(x_nhwc, w_oihw, gamma, beta, run_mean, run_var,
                          eps=1e-5, *, compute_dtype=jnp.float32,
                          out_dtype=jnp.float32, max_tile_h=None,
                          min_grid_steps=8):
    """Upsample block forward, NHWC in -> NHWC out (production entry point)."""
    n, h, w, cin = x_nhwc.shape
    cout = w_oihw.shape[0]

    # ---- Fold BN (inference form) into the 1x1 conv ----------------------
    inv_std = 1.0 / jnp.sqrt(run_var.astype(jnp.float32) + eps)
    scale = gamma.astype(jnp.float32) * inv_std                      # (Cout,)
    bias = beta.astype(jnp.float32) - run_mean.astype(jnp.float32) * scale
    w2 = w_oihw.reshape(cout, cin).astype(jnp.float32)               # (Cout, Cin)
    w_folded = (w2 * scale[:, None]).T                               # (Cin, Cout) f32

    # ---- Pad Cout to a lane multiple (128) and W to a sublane multiple (8) ----
    cout_p = _round_up(cout, 128)
    w_p = _round_up(w, 8)
    if cout_p != cout:
        w_folded = jnp.pad(w_folded, ((0, 0), (0, cout_p - cout)))
        bias = jnp.pad(bias, (0, cout_p - cout))
    if w_p != w:
        x_nhwc = jnp.pad(x_nhwc, ((0, 0), (0, 0), (0, w_p - w), (0, 0)))

    w_folded = w_folded.astype(compute_dtype)
    bias2 = bias.reshape(1, cout_p)          # stays f32; added post-matmul in f32
    x_in = x_nhwc.astype(compute_dtype)

    in_bytes = jnp.dtype(compute_dtype).itemsize
    out_bytes = jnp.dtype(out_dtype).itemsize

    # ---- Generation-aware VMEM budgeting ----------------------------------
    vmem_cap = _vmem_capacity_bytes()
    vmem_limit = max(32 << 20, min(int(vmem_cap * 3 // 4), vmem_cap - (8 << 20)))
    fixed_bytes = 2 * cin * cout_p * in_bytes + cout_p * 4           # weight + bias
    tile_budget = max(1 << 20, vmem_cap // 2 - fixed_bytes)

    tile_h = _pick_tile_h(h, n, w_p, cin, cout_p, in_bytes, out_bytes,
                          tile_budget, max_tile_h=max_tile_h,
                          min_grid_steps=min_grid_steps)
    n_th = pl.cdiv(h, tile_h)
    h_p = n_th * tile_h
    if h_p != h:
        x_in = jnp.pad(x_in, ((0, 0), (0, h_p - h), (0, 0), (0, 0)))

    grid = (n, n_th)

    cost = pl.CostEstimate(
        flops=2 * n * h_p * w_p * cin * cout_p,
        transcendentals=0,
        bytes_accessed=(n * h_p * w_p * cin * in_bytes
                        + cin * cout_p * in_bytes + cout_p * 4
                        + n * h_p * 2 * 2 * w_p * cout_p * out_bytes),
    )

    out5 = pl.pallas_call(
        _upsample_kernel,
        out_shape=jax.ShapeDtypeStruct((n, h_p, 2, 2 * w_p, cout_p), out_dtype),
        grid=grid,
        in_specs=[
            pl.BlockSpec((1, tile_h, w_p, cin), lambda i, j: (i, j, 0, 0)),
            pl.BlockSpec((cin, cout_p), lambda i, j: (0, 0)),
            pl.BlockSpec((1, cout_p), lambda i, j: (0, 0)),
        ],
        out_specs=pl.BlockSpec((1, tile_h, 2, 2 * w_p, cout_p),
                               lambda i, j: (i, j, 0, 0, 0)),
        compiler_params=pltpu.CompilerParams(
            dimension_semantics=("parallel", "parallel"),
            vmem_limit_bytes=int(vmem_limit)),
        cost_estimate=cost,
    )(x_in, w_folded, bias2)

    # (N, Hp, 2, 2Wp, Cp) -> (N, 2Hp, 2Wp, Cp): only merges two leading dims;
    # the minor-dim (2Wp, Cp) tiling is unchanged, so this is layout-preserving.
    out = out5.reshape(n, 2 * h_p, 2 * w_p, cout_p)
    # Drop the H/W/channel padding.
    return out[:, :2 * h, :2 * w, :cout]


def upsample_forward(x_nchw, w_oihw, gamma, beta, run_mean, run_var,
                     eps=1e-5, **kwargs):
    """PyTorch-compatible adapter: NCHW in -> NCHW out (layout glue only)."""
    x_nhwc = jnp.transpose(x_nchw, (0, 2, 3, 1))
    z = upsample_forward_nhwc(x_nhwc, w_oihw, gamma, beta, run_mean, run_var,
                              eps, **kwargs)
    return jnp.transpose(z, (0, 3, 1, 2))


def _reference(x_nchw, w_oihw, gamma, beta, run_mean, run_var, eps=1e-5):
    """Pure-JAX reference for the same forward pass (NCHW)."""
    cout, cin = w_oihw.shape[0], w_oihw.shape[1]
    x = x_nchw.astype(jnp.float32)
    w2 = w_oihw.reshape(cout, cin).astype(jnp.float32)
    y = jnp.einsum('nchw,oc->nohw', x, w2)                       # 1x1 conv
    y = (y - run_mean[None, :, None, None]) / jnp.sqrt(run_var + eps)[None, :, None, None]
    y = y * gamma[None, :, None, None] + beta[None, :, None, None]
    y = jnp.where(y >= 0, y, 0.1 * y)                            # LeakyReLU(0.1)
    y = jnp.repeat(jnp.repeat(y, 2, axis=2), 2, axis=3)          # nearest 2x
    return y


if __name__ == "__main__":
    key = jax.random.PRNGKey(0)
    k_x, k_w, k_g, k_b, k_m, k_v = jax.random.split(key, 6)

    N, C_IN, C_OUT = 2, 4, 8
    conv_w = jax.random.normal(k_w, (C_OUT, C_IN, 1, 1), dtype=jnp.float32) * 0.1
    gamma = 1.0 + 0.1 * jax.random.normal(k_g, (C_OUT,), dtype=jnp.float32)
    beta = 0.1 * jax.random.normal(k_b, (C_OUT,), dtype=jnp.float32)
    run_mean = 0.1 * jax.random.normal(k_m, (C_OUT,), dtype=jnp.float32)
    run_var = 0.5 + jax.random.uniform(k_v, (C_OUT,), dtype=jnp.float32)

    # Test 1: aligned toy spatial size (exercises the H-tiled grid).
    H, W = 16, 16
    x = jax.random.normal(k_x, (N, C_IN, H, W), dtype=jnp.float32)
    out = upsample_forward(x, conv_w, gamma, beta, run_mean, run_var)
    out = jax.block_until_ready(out)
    ref = _reference(x, conv_w, gamma, beta, run_mean, run_var)
    assert out.shape == (N, C_OUT, 2 * H, 2 * W), out.shape
    assert jnp.allclose(out, ref, atol=1e-4, rtol=1e-4), "mismatch (aligned case)"

    # Test 2: real YOLOv4-tiny-like odd spatial size (13x13) exercising the
    # W / H / channel padding paths.
    H2, W2 = 13, 13
    x2 = jax.random.normal(k_x, (N, C_IN, H2, W2), dtype=jnp.float32)
    out2 = upsample_forward(x2, conv_w, gamma, beta, run_mean, run_var)
    out2 = jax.block_until_ready(out2)
    ref2 = _reference(x2, conv_w, gamma, beta, run_mean, run_var)
    assert out2.shape == (N, C_OUT, 2 * H2, 2 * W2), out2.shape
    assert jnp.allclose(out2, ref2, atol=1e-4, rtol=1e-4), "mismatch (odd case)"

    print("KERNEL_OK")
</pallas_src>

<mosaic_0001>
module attributes {stable_mosaic.version = 11 : i64} {
  func.func @_upsample_kernel(%arg0: i32, %arg1: i32, %arg2: memref<1x4x16x4xf32, #tpu.memory_space<vmem>>, %arg3: memref<4x128xf32, #tpu.memory_space<vmem>>, %arg4: memref<1x128xf32, #tpu.memory_space<vmem>>, %arg5: memref<1x4x2x32x128xf32, #tpu.memory_space<vmem>>) attributes {dimension_semantics = [#tpu.dimension_semantics<parallel>, #tpu.dimension_semantics<parallel>], iteration_bounds = array<i64: 2, 4>, scalar_prefetch = 0 : i64, scratch_operands = 0 : i64, tpu.core_type = #tpu.core_type<tc>, window_params = [{transform_indices = @transform_0, window_bounds = array<i64: 1, 4, 16, 4>}, {pipeline_mode = #tpu.pipeline_mode<synchronous>, transform_indices = @transform_1, window_bounds = array<i64: 4, 128>}, {pipeline_mode = #tpu.pipeline_mode<synchronous>, transform_indices = @transform_2, window_bounds = array<i64: 1, 128>}, {transform_indices = @transform_3, window_bounds = array<i64: 1, 4, 2, 32, 128>}]} {
    %c0 = arith.constant 0 : index
    %c0_0 = arith.constant 0 : index
    %c0_1 = arith.constant 0 : index
    %c0_2 = arith.constant 0 : index
    %0 = vector.load %arg2[%c0, %c0_0, %c0_1, %c0_2] : memref<1x4x16x4xf32, #tpu.memory_space<vmem>>, vector<1x4x16x4xf32>
    %1 = vector.shape_cast %0 : vector<1x4x16x4xf32> to vector<4x16x4xf32>
    %2 = vector.shape_cast %1 : vector<4x16x4xf32> to vector<64x4xf32>
    %c0_3 = arith.constant 0 : index
    %c0_4 = arith.constant 0 : index
    %3 = vector.load %arg3[%c0_3, %c0_4] : memref<4x128xf32, #tpu.memory_space<vmem>>, vector<4x128xf32>
    %cst = arith.constant dense<0.000000e+00> : vector<64x128xf32>
    %4 = tpu.matmul %2, %3, %cst {dimension_numbers = #tpu.dot_dimension_numbers<[1], [0], [0], [1], [0, 0, 1, 1], [], []>} : vector<64x4xf32>, vector<4x128xf32>, vector<64x128xf32> -> vector<64x128xf32>
    %c0_5 = arith.constant 0 : index
    %c0_6 = arith.constant 0 : index
    %5 = vector.load %arg4[%c0_5, %c0_6] : memref<1x128xf32, #tpu.memory_space<vmem>>, vector<1x128xf32>
    %6 = vector.broadcast %5 : vector<1x128xf32> to vector<64x128xf32>
    %7 = arith.addf %4, %6 : vector<64x128xf32>
    %cst_7 = arith.constant 0.000000e+00 : f32
    %8 = vector.broadcast %cst_7 : f32 to vector<64x128xf32>
    %9 = arith.cmpf oge, %7, %8 : vector<64x128xf32>
    %cst_8 = arith.constant 1.000000e-01 : f32
    %10 = vector.broadcast %cst_8 : f32 to vector<64x128xf32>
    %11 = arith.mulf %10, %7 : vector<64x128xf32>
    %12 = arith.select %9, %7, %11 : vector<64x128xi1>, vector<64x128xf32>
    %13 = vector.shape_cast %12 : vector<64x128xf32> to vector<4x16x128xf32>
    %14 = vector.shape_cast %13 : vector<4x16x128xf32> to vector<4x16x1x128xf32>
    %15 = vector.shape_cast %14 : vector<4x16x1x128xf32> to vector<4x16x1x128xf32>
    %16 = vector.broadcast %15 : vector<4x16x1x128xf32> to vector<4x16x2x128xf32>
    %17 = vector.shape_cast %16 : vector<4x16x2x128xf32> to vector<4x32x128xf32>
    %18 = vector.shape_cast %17 : vector<4x32x128xf32> to vector<4x1x32x128xf32>
    %19 = vector.shape_cast %18 : vector<4x1x32x128xf32> to vector<4x1x32x128xf32>
    %20 = vector.broadcast %19 : vector<4x1x32x128xf32> to vector<4x2x32x128xf32>
    %c0_9 = arith.constant 0 : index
    %c0_10 = arith.constant 0 : index
    %c0_11 = arith.constant 0 : index
    %c0_12 = arith.constant 0 : index
    %c0_13 = arith.constant 0 : index
    %21 = vector.load %arg5[%c0_9, %c0_10, %c0_11, %c0_12, %c0_13] : memref<1x4x2x32x128xf32, #tpu.memory_space<vmem>>, vector<1x4x2x32x128xf32>
    %22 = vector.shape_cast %21 : vector<1x4x2x32x128xf32> to vector<4x2x32x128xf32>
    %23 = vector.shape_cast %20 : vector<4x2x32x128xf32> to vector<1x4x2x32x128xf32>
    tpu.vector_store %arg5[%c0_9, %c0_10, %c0_11, %c0_12, %c0_13], %23 {strides = array<i32>} : memref<1x4x2x32x128xf32, #tpu.memory_space<vmem>>, vector<1x4x2x32x128xf32>,
    return
  }
  func.func @transform_0(%arg0: i32, %arg1: i32) -> (i32, i32, i32, i32) {
    %c0_i32 = arith.constant 0 : i32
    %c0_i32_0 = arith.constant 0 : i32
    %c0_i32_1 = arith.constant 0 : i32
    return %arg0, %arg1, %c0_i32, %c0_i32_0 : i32, i32, i32, i32
  }
  func.func @transform_1(%arg0: i32, %arg1: i32) -> (i32, i32) {
    %c0_i32 = arith.constant 0 : i32
    %c0_i32_0 = arith.constant 0 : i32
    %c0_i32_1 = arith.constant 0 : i32
    return %c0_i32, %c0_i32_0 : i32, i32
  }
  func.func @transform_2(%arg0: i32, %arg1: i32) -> (i32, i32) {
    %c0_i32 = arith.constant 0 : i32
    %c0_i32_0 = arith.constant 0 : i32
    %c0_i32_1 = arith.constant 0 : i32
    return %c0_i32, %c0_i32_0 : i32, i32
  }
  func.func @transform_3(%arg0: i32, %arg1: i32) -> (i32, i32, i32, i32, i32) {
    %c0_i32 = arith.constant 0 : i32
    %c0_i32_0 = arith.constant 0 : i32
    %c0_i32_1 = arith.constant 0 : i32
    %c0_i32_2 = arith.constant 0 : i32
    return %arg0, %arg1, %c0_i32, %c0_i32_0, %c0_i32_1 : i32, i32, i32, i32, i32
  }
}

</mosaic_0001>

<bundles_post_ra>
// kernel: tpu_custom_call.1
= control target key start
LH: loop header
LB: loop body
LE: loop exit
PB: predicated region body
PF: predicated region fallthrough
CT: control target
= control target key end

     0   :  { %8 = vsyncpa [#allocation3], 0  ;;  %s2087_s0 = inlined_call_operand.vmem [shape: f32[2,16,16,4], index: 0, kind: input, shape index: {}]   ;;  %s2088_s1 = inlined_call_operand.vmem [shape: f32[4,128], index: 1, kind: input, shape index: {}]   ;;  %s2089_s2 = inlined_call_operand.vmem [shape: f32[1,128], index: 2, kind: input, shape index: {}]   ;;  %s2090_s3 = inlined_call_operand.hbm [shape: f32[2,16,2,32,128], index: 3, kind: output, shape index: {}]  }
   0x1   :  { %10 = vsyncpa [#allocation3 + $0x1], 0  ;;  %s1704_s12 = smov 0   ;;  %s1706_s13 = smov 0  }
   0x2   :  { %s1708_s14 = smov 0   ;;  %s1710_s15 = smov 0  }
   0x3   :  { %s1712_s16 = smov 0   ;;  %s1714_s17 = smov 0  }
   0x4   :  { %s1716_s18 = smov 0   ;;  %s1718_s19 = smov 0  }
   0x5 LB: > { %s1455_s20 = sadd.s32 4294967295, %s1677_s19   ;;  %s1456_s21 = sadd.s32 4294967294, %s1677_s19   ;;  %s1677_s19 = sphi %s1718_s19, %s16_s19   ;;  %s1673_s18 = sphi %s1716_s18, %s2099_s18   ;;  %s1669_s17 = sphi %s1714_s17, %s2098_s17   ;;  %s1665_s16 = sphi %s1712_s16, %s2097_s16   ;;  %s1661_s15 = sphi %s1710_s15, %s2096_s15   ;;  %s1657_s14 = sphi %s1708_s14, %s2095_s14   ;;  %s1653_s13 = sphi %s1706_s13, %s2094_s13   ;;  %s1649_s12 = sphi %s1704_s12, %s2093_s12  }
   0x6   : > { %s25_s22 = sadd.s32 1, %s1669_s17  ;;  %s28_s23 = sadd.s32 1, %s1673_s18 }
   0x7   : > { %p26_p0 = scmp.ge.s32.totalorder %s25_s22, 4  ;;  %p117_p1 = scmp.ne.s32.totalorder %s1657_s14, %s1653_s13 }
   0x8   : > { %p118_p2 = scmp.eq.s32.totalorder %s1455_s20, 7  ;;  %p123_p5 = scmp.ne.s32.totalorder %s1653_s13, %s1649_s12 }
   0x9   : > { %s2101_s22 = smov (%p26_p0, %s25_s22), 0  ;;  %s2103_s23 = smov (!%p26_p0, %s28_s23), %s1673_s18 }
   0xa   : > { %s103_s24 = ssub.s32 %s1669_s17, %s2101_s22  ;;  %p1755_p3 = por %p118_p2, %p117_p1 }
   0xb   : > { %p30_p4 = scmp.ge.s32.totalorder %s2103_s23, 2  ;;  %p124_p6 = scmp.eq.s32.totalorder %s1456_s21, 7 }
   0xc   : > { %p1459_p7 = scmp.ge.s32.totalorder %s1677_s19, 1  ;;  %p162_p9 = scmp.lt.s32.totalorder %s1677_s19, 9 }
   0xd   : > { %s2105_s23 = smov (%p30_p4, %s2103_s23), 0  ;;  %p1764_p8 = por %p124_p6, %p123_p5 }
   0xe   : > { %s102_s27 = ssub.s32 %s1673_s18, %s2105_s23  ;;  %s107_s28 = sadd.s32 1, %s1657_s14 }
   0xf   : > { %s104_s29 = sor.u32 %s103_s24, %s102_s27  ;;  %p163_p10 = pnand %p1459_p7, %p162_p9 }
  0x10   : > { %p105_p11 = scmp.eq.s32.totalorder %s104_s29, 0  ;;  %v211_v0 = vld [vmem:[%s2088_s1] sm:$0xf] (!%p163_p10)  ;;  %vm244_vm0 = vcmask (!%p163_p10), 1043456   ;;  %s1461_s6 = sshll.u32 (!%p163_p10), %s1661_s15, 2  ;;  %vm219_vm1 = vcmask (!%p163_p10), 31744   ;;  %v389_v11 = vlaneseq (!%p163_p10) }
  0x11   : > { %166 = sbr.rel (%p163_p10) target bundleno = 340 (0x154), region = 32  ;;  %p192_p12 = scmp.lt.s32.totalorder (!%p163_p10), %s1665_s16, 1  ;;  %1492 = vmatprep.subr.msk.mxu0 (!%p163_p10), %vm244_vm0, %v211_v0  ;;  %1506 = vmatprep.subr.msk.mxu1 (!%p163_p10), %vm244_vm0, %v211_v0  ;;  %v1679_v9 = vmov (!%p163_p10), 1966171168   ;;  %v1680_v12 = vmov (!%p163_p10), 1983009808  }
  0x12   : > { %s1773_s30 = scalar_select %p105_p11, %s1657_s14, %s107_s28  }
  0x13   : > { %p194_p13 = scmp.lt.s32.totalorder (!%p163_p10), %s1461_s6, 15  ;;  %1493 = vmatpush3.msk.msra.mxu0 (!%p163_p10), %vm244_vm0, %v211_v0  ;;  %1507 = vmatpush3.msk.msra.mxu1 (!%p163_p10), %vm244_vm0, %v211_v0  ;;  %v387_v10 = vunpack.c.l.s4 (!%p163_p10), %v1679_v9  ;;  %v1036_v13 = vunpack.c.l.s4 (!%p163_p10), %v1680_v12  ;;  %v1795_v14 = vld [vmem:[%s2089_s2] ss:$0 sm:$0xff] (!%p163_p10)  ;;  %v390_v16 = vshrl.u32 (!%p163_p10), %v389_v11, 7  ;;  %s188_s29 = sand.u32 (!%p163_p10), 1, %s1653_s13  }
  0x14   : > { %s1460_s4 = sshll.u32 (!%p163_p10), %s188_s29, 8  ;;  %s2035_s20 = scalar_lea.sflag (!%p163_p10), [#allocation3], %s188_s29 }
  0x15   : > { %v388_v15 = vunpack.c.0.s8 (!%p163_p10), %v387_v10  ;;  %v1037_v20 = vunpack.c.0.s8 (!%p163_p10), %v1036_v13  ;;  %v1803_v32 = vsub.s32 (!%p163_p10), 0, %v390_v16  ;;  %s1858_s5 = scalar_lea.vmem (!%p163_p10), [#allocation2], %s1460_s4 }
  0x17   : > { %v1799_v24 = vsub.s32 (!%p163_p10), %v388_v15, %v390_v16  ;;  %v1805_v33 = vsub.s32 (!%p163_p10), %v1037_v20, %v390_v16 }
  0x18   : > { %s193_s7 = scalar_select %p192_p12, %s1665_s16, 1 }
  0x19   : > { %s2107_s6 = smov (!%p194_p13, %s1461_s6), 15 }
  0x1a   : > { %s1463_s8 = sshll.u32 %s193_s7, 5  ;;  %s1462_s9 = sshll.u32 %s2107_s6, 1 }
  0x1b   : > { %s198_s10 = sadd.s32 %s1463_s8, %s1462_s9  ;;  %s1482_s6 = sshll.u32 %s1661_s15, 5 }
  0x1c   : > { %s1464_s11 = sshll.u32 %s198_s10, 3  ;;  %s1478_s7 = sshll.u32 %s1665_s16, 7 }
  0x1d   : > { %s200_s24 = scalar_lea.vmem %s2087_s0, %s1464_s11  ;;  %s1367_s8 = sadd.s32 %s1482_s6, %s1478_s7 }
  0x1e   : > { %v203_v1 = vld [vmem:[%s200_s24] sm:$0xff]  ;;  %v204_v3 = vld [vmem:[%s200_s24 + $0x8] sm:$0xff]  ;;  %v205_v5 = vld [vmem:[%s200_s24 + $0x10] sm:$0xff]  ;;  %s1479_s15 = sshll.u32 %s1367_s8, 7  ;;  %s1370_s16 = sshll.u32 %s1858_s5, 4  ;;  %s2027_s16 = int_to_ptr.vmem [resolvable:$true] %s1370_s16 }
  0x1f   : > { %v207_v2 = vld [vmem:[%s200_s24 + $0x20] sm:$0xff]  ;;  %1494 = vmatprep.mubr.msk.f32.mxu0 %vm219_vm1, %v203_v1  ;;  %v208_v4 = vld [vmem:[%s200_s24 + $0x28] sm:$0xff]  ;;  %v209_v6 = vld [vmem:[%s200_s24 + $0x30] sm:$0xff]  ;;  %s2025_s11 = scalar_lea.hbm %s2090_s3, %s1479_s15  ;;  %s1583_s21 = scalar_lea.vmem %s2027_s16, 4096 }
  0x20   : > { %1500 = vmatprep.mubr.msk.f32.mxu1 %vm219_vm1, %v207_v2  ;;  %1495 = vmatmul.mubr.msk.f32.vlgmr.msra.gmra.mrb[0].mxu0 %vm219_vm1, %v204_v3  ;;  %v206_v7 = vld [vmem:[%s200_s24 + $0x18] sm:$0xff]  ;;  %p1584_p0 = scmp.ne.s32.totalorder %s2027_s16, %s1583_s21 }
  0x21   : > { %1501 = vmatmul.mubr.msk.f32.vlgmr.msra.gmra.mrb[0].mxu1 %vm219_vm1, %v208_v4  ;;  %1497 = vmatprep.mubr.msk.f32.mxu0 %vm219_vm1, %v205_v5  ;;  %v210_v8 = vld [vmem:[%s200_s24 + $0x38] sm:$0xff]  ;;  %s1681_s24 = smov [#allocation2]  }
  0x22   : > { %1503 = vmatprep.mubr.msk.f32.mxu1 %vm219_vm1, %v209_v6  ;;  %p1585_p1 = pnand %p1584_p0, %p1755_p3  ;;  %s1587_s27 = sshll.u32 %s1681_s24, 4  ;;  %s1588_s27 = int_to_ptr.vmem [resolvable:$false] %s1587_s27 }
  0x23   : > { %s1589_s28 = scalar_lea.vmem %s1588_s27, 8192  ;;  %p1590_p4 = scmp.lt.s32.totalorder %s2027_s16, %s1588_s27 }
  0x24   : > { %1498 = vmatmul.mubr.msk.f32.gmra.mrb[2].mxu0 %vm219_vm1, %v206_v7  ;;  %p1586_p2 = pneg %p1585_p1  ;;  %p1591_p5 = scmp.lt.s32.totalorder %s1589_s28, %s1583_s21 }
  0x25   : > { %1504 = vmatmul.mubr.msk.f32.gmra.mrb[2].mxu1 %vm219_vm1, %v210_v8 }
  0x26   : > { %p1592_p6 = por %p1591_p5, %p1590_p4 }
  0x28   : > { %p1593_p7 = pnand %p1592_p6, %p1586_p2 }
  0xf3   : > { %v1496_v17 = vpop.f32.mrb[0].mxu0 }
  0xf4   : > { %v1502_v18 = vpop.f32.mrb[0].mxu1  ;;  %v320_v19 = vadd.f32 %v1496_v17, %v1795_v14  ;;  %v314_v22 = vpop.f32.mrb[1].mxu0 }
  0xf5   : > { %v340_v21 = vadd.f32 %v1502_v18, %v1795_v14  ;;  %v334_v23 = vpop.f32.mrb[1].mxu1  ;;  %v315_v25 = vadd.f32 %v1795_v14, %v314_v22 }
  0xf6   : > { %v335_v26 = vadd.f32 %v1795_v14, %v334_v23  ;;  %vm354_vm2 = vcmp.ge.f32.partialorder %v320_v19, 0.0  ;;  %v362_v27 = vmul.f32 0.1, %v320_v19 }
  0xf7   : > { %vm358_vm3 = vcmp.ge.f32.partialorder %v340_v21, 0.0  ;;  %v366_v28 = vmul.f32 0.1, %v340_v21  ;;  %vm353_vm4 = vcmp.ge.f32.partialorder %v315_v25, 0.0  ;;  %v361_v29 = vmul.f32 0.1, %v315_v25 }
  0xf8   : > { %vm357_vm5 = vcmp.ge.f32.partialorder %v335_v26, 0.0  ;;  %v365_v30 = vmul.f32 0.1, %v335_v26  ;;  %v370_v31 = vsel %vm354_vm2, %v320_v19, %v362_v27  ;;  %v1499_v35 = vpop.f32.mrb[2].mxu0  ;;  %v1505_v36 = vpop.f32.mrb[2].mxu1 }
  0xf9   : > { %v374_v34 = vsel %vm358_vm3, %v340_v21, %v366_v28  ;;  %v434_v37 = vcombine.high %v370_v31, %v370_v31  ;;  %v441_v38 = vrot.slane %v370_v31, %v1799_v24  ;;  %v1809_v41 = vpop.f32.mrb[3].mxu0  ;;  %v1811_v42 = vpop.f32.mrb[3].mxu1  ;;  %v369_v43 = vsel %vm353_vm4, %v315_v25, %v361_v29 }
  0xfa   : > { %v630_v39 = vcombine.high %v374_v34, %v374_v34  ;;  %v637_v40 = vrot.slane %v374_v34, %v1799_v24  ;;  %v1814_v44 = vsel %vm357_vm5, %v335_v26, %v365_v30  ;;  %v1817_v45 = vadd.f32 %v1499_v35, %v1795_v14 }
  0xfb   : > { %v1820_v46 = vadd.f32 %v1505_v36, %v1795_v14  ;;  %v448_v47 = vrot.slane %v434_v37, %v1799_v24  ;;  %v449_v48 = vcombine.high %v441_v38, %v441_v38  ;;  %v457_v49 = vrot.slane %v441_v38, %v1799_v24 }
  0xfc   : > { %v644_v50 = vrot.slane %v630_v39, %v1799_v24  ;;  %v645_v51 = vcombine.high %v637_v40, %v637_v40  ;;  %v653_v52 = vrot.slane %v637_v40, %v1799_v24  ;;  %v385_v53 = vcombine.high %v369_v43, %v369_v43 }
  0xfd   : > { %v392_v54 = vrot.slane %v369_v43, %v1799_v24  ;;  %v450_v55 = vcombine.high %v448_v47, %v448_v47  ;;  %v464_v56 = vrot.slane %v448_v47, %v1799_v24  ;;  %v471_v57 = vrot.slane %v449_v48, %v1799_v24 }
  0xfe   : > { %v479_v58 = vcombine.high %v457_v49, %v457_v49  ;;  %v812_v59 = vrot.slane %v457_v49, %v1803_v32  ;;  %v646_v60 = vcombine.high %v644_v50, %v644_v50  ;;  %v660_v61 = vrot.slane %v644_v50, %v1799_v24 }
  0xff   : > { %v667_v62 = vrot.slane %v645_v51, %v1799_v24  ;;  %v478_v63 = vrot.slane %v450_v55, %v1799_v24  ;;  %v480_v0 = vcombine.high %v464_v56, %v464_v56  ;;  %v481_v1 = vcombine.high %v471_v57, %v471_v57 }
 0x100   : > { %v816_v2 = vrot.slane %v471_v57, %v1803_v32  ;;  %v820_v3 = vrot.slane %v479_v58, %v1803_v32  ;;  %v828_v4 = vrot.slane %v464_v56, %v1803_v32  ;;  %v674_v5 = vrot.slane %v646_v60, %v1799_v24 }
 0x101   : > { %v675_v6 = vcombine.high %v653_v52, %v653_v52  ;;  %v482_v7 = vcombine.high %v478_v63, %v478_v63  ;;  %v824_v8 = vrot.slane %v481_v1, %v1803_v32  ;;  %v832_v9 = vrot.slane %v478_v63, %v1803_v32 }
 0x102   : > { %v836_v10 = vrot.slane %v480_v0, %v1803_v32  ;;  %v1067_v11 = vcombine.low %v812_v59, %v816_v2  ;;  %v676_v12 = vcombine.high %v660_v61, %v660_v61  ;;  %v677_v13 = vcombine.high %v667_v62, %v667_v62 }
 0x103   : > { %v678_v15 = vcombine.high %v674_v5, %v674_v5  ;;  %v840_v16 = vrot.slane %v482_v7, %v1803_v32  ;;  %v1068_v17 = vcombine.low %v820_v3, %v824_v8  ;;  %v1084_v18 = vcombine.low %v828_v4, %v832_v9 }
 0x104   : > { %v940_v19 = vrot.slane %v653_v52, %v1803_v32  ;;  %v1075_v20 = vrot.slane %v1067_v11, %v1805_v33  ;;  %v944_v21 = vrot.slane %v667_v62, %v1803_v32  ;;  %v948_v22 = vrot.slane %v675_v6, %v1803_v32 }
 0x105   : > { %v952_v23 = vrot.slane %v677_v13, %v1803_v32  ;;  %v1082_v25 = vrot.slane %v1068_v17, %v1805_v33  ;;  %v1085_v26 = vcombine.low %v836_v10, %v840_v16  ;;  %v1092_v27 = vrot.slane %v1084_v18, %v1805_v33 }
 0x106   : > { %v956_v28 = vrot.slane %v660_v61, %v1803_v32  ;;  %v960_v29 = vrot.slane %v674_v5, %v1803_v32  ;;  %v964_v30 = vrot.slane %v676_v12, %v1803_v32  ;;  %v968_v31 = vrot.slane %v678_v15, %v1803_v32 }
 0x107   : > { %v1203_v34 = vcombine.low %v940_v19, %v944_v21  ;;  %v1083_v35 = vcombine.low %v1075_v20, %v1082_v25  ;;  %v1099_v36 = vrot.slane %v1085_v26, %v1805_v33  ;;  %v1204_v37 = vcombine.low %v948_v22, %v952_v23 }
 0x108   : > { %v399_v38 = vrot.slane %v385_v53, %v1799_v24  ;;  %v1220_v40 = vcombine.low %v956_v28, %v960_v29  ;;  %v1221_v43 = vcombine.low %v964_v30, %v968_v31  ;;  %v400_v47 = vcombine.high %v392_v54, %v392_v54 }
 0x109   : > { %v1211_v39 = vrot.slane %v1203_v34, %v1805_v33  ;;  %v1100_v48 = vcombine.low %v1092_v27, %v1099_v36  ;;  %1323 = vst [vmem:[%s1858_s5 + $0x10] sm:$0xff] %v1083_v35  ;;  %1327 = vst [vmem:[%s1858_s5 + $0x30] sm:$0xff] %v1083_v35  ;;  %v1218_v49 = vrot.slane %v1204_v37, %v1805_v33  ;;  %vm356_vm6 = vcmp.ge.f32.partialorder %v1817_v45, 0.0 }
 0x10a   : > { %v401_v50 = vcombine.high %v399_v38, %v399_v38  ;;  %v408_v51 = vrot.slane %v392_v54, %v1799_v24  ;;  %v1228_v52 = vrot.slane %v1220_v40, %v1805_v33  ;;  %v1235_v53 = vrot.slane %v1221_v43, %v1805_v33 }
 0x10b   : > { %v415_v55 = vrot.slane %v399_v38, %v1799_v24  ;;  %v422_v56 = vrot.slane %v400_v47, %v1799_v24  ;;  %1324 = vst [vmem:[%s1858_s5 + $0x18] sm:$0xff] %v1100_v48  ;;  %1328 = vst [vmem:[%s1858_s5 + $0x38] sm:$0xff] %v1100_v48  ;;  %v1219_v57 = vcombine.low %v1211_v39, %v1218_v49  ;;  %v364_v15 = vmul.f32 0.1, %v1817_v45 }
 0x10c   : > { %v429_v58 = vrot.slane %v401_v50, %v1799_v24  ;;  %v430_v59 = vcombine.high %v408_v51, %v408_v51  ;;  %v780_v60 = vrot.slane %v408_v51, %v1803_v32  ;;  %v1236_v54 = vcombine.low %v1228_v52, %v1235_v53 }
 0x10d   : > { %v431_v61 = vcombine.high %v415_v55, %v415_v55  ;;  %v432_v62 = vcombine.high %v422_v56, %v422_v56  ;;  %v784_v63 = vrot.slane %v422_v56, %v1803_v32  ;;  %1339 = vst [vmem:[%s1858_s5 + $0x90] sm:$0xff] %v1219_v57  ;;  %1343 = vst [vmem:[%s1858_s5 + $0xb0] sm:$0xff] %v1219_v57  ;;  %vm360_vm7 = vcmp.ge.f32.partialorder %v1820_v46, 0.0 }
 0x10e   : > { %v433_v0 = vcombine.high %v429_v58, %v429_v58  ;;  %v788_v1 = vrot.slane %v430_v59, %v1803_v32  ;;  %v796_v2 = vrot.slane %v415_v55, %v1803_v32  ;;  %v800_v3 = vrot.slane %v429_v58, %v1803_v32  ;;  %1340 = vst [vmem:[%s1858_s5 + $0x98] sm:$0xff] %v1236_v54 }
 0x10f   : > { %1344 = vst [vmem:[%s1858_s5 + $0xb8] sm:$0xff] %v1236_v54  ;;  %v792_v4 = vrot.slane %v432_v62, %v1803_v32  ;;  %v804_v5 = vrot.slane %v431_v61, %v1803_v32  ;;  %v1033_v6 = vcombine.low %v780_v60, %v784_v63  ;;  %v581_v7 = vcombine.high %v1814_v44, %v1814_v44 }
 0x110   : > { %v808_v8 = vrot.slane %v433_v0, %v1803_v32  ;;  %v1050_v9 = vcombine.low %v796_v2, %v800_v3  ;;  %v588_v10 = vrot.slane %v1814_v44, %v1799_v24  ;;  %v372_v22 = vsel %vm356_vm6, %v1817_v45, %v364_v15 }
 0x111   : > { %v1034_v11 = vcombine.low %v788_v1, %v792_v4  ;;  %v1041_v12 = vrot.slane %v1033_v6, %v1805_v33  ;;  %v595_v13 = vrot.slane %v581_v7, %v1799_v24  ;;  %v532_v40 = vcombine.high %v372_v22, %v372_v22 }
 0x112   : > { %v1051_v16 = vcombine.low %v804_v5, %v808_v8  ;;  %v1058_v17 = vrot.slane %v1050_v9, %v1805_v33  ;;  %v596_v18 = vcombine.high %v588_v10, %v588_v10  ;;  %v604_v19 = vrot.slane %v588_v10, %v1799_v24 }
 0x113   : > { %v1048_v20 = vrot.slane %v1034_v11, %v1805_v33  ;;  %v597_v21 = vcombine.high %v595_v13, %v595_v13  ;;  %v611_v44 = vrot.slane %v595_v13, %v1799_v24  ;;  %v539_v48 = vrot.slane %v372_v22, %v1799_v24 }
 0x114   : > { %v1065_v23 = vrot.slane %v1051_v16, %v1805_v33  ;;  %v618_v25 = vrot.slane %v596_v18, %v1799_v24  ;;  %v626_v26 = vcombine.high %v604_v19, %v604_v19  ;;  %v908_v27 = vrot.slane %v604_v19, %v1803_v32 }
 0x115   : > { %v1049_v28 = vcombine.low %v1041_v12, %v1048_v20  ;;  %v625_v29 = vrot.slane %v597_v21, %v1799_v24  ;;  %v627_v30 = vcombine.high %v611_v44, %v611_v44  ;;  %v924_v31 = vrot.slane %v611_v44, %v1803_v32 }
 0x116   : > { %v1066_v34 = vcombine.low %v1058_v17, %v1065_v23  ;;  %v628_v35 = vcombine.high %v618_v25, %v618_v25  ;;  %v912_v36 = vrot.slane %v618_v25, %v1803_v32  ;;  %v916_v45 = vrot.slane %v626_v26, %v1803_v32 }
 0x117   : > { %1321 = vst [vmem:[%s1858_s5] sm:$0xff] %v1049_v28  ;;  %1325 = vst [vmem:[%s1858_s5 + $0x20] sm:$0xff] %v1049_v28  ;;  %v629_v37 = vcombine.high %v625_v29, %v625_v29  ;;  %v928_v38 = vrot.slane %v625_v29, %v1803_v32  ;;  %v932_v39 = vrot.slane %v627_v30, %v1803_v32  ;;  %v368_v52 = vmul.f32 0.1, %v1820_v46 }
 0x118   : > { %1322 = vst [vmem:[%s1858_s5 + $0x8] sm:$0xff] %v1066_v34  ;;  %1326 = vst [vmem:[%s1858_s5 + $0x28] sm:$0xff] %v1066_v34  ;;  %v920_v43 = vrot.slane %v628_v35, %v1803_v32  ;;  %v1169_v47 = vcombine.low %v908_v27, %v912_v36  ;;  %v546_v51 = vrot.slane %v532_v40, %v1799_v24 }
 0x119   : > { %v936_v49 = vrot.slane %v629_v37, %v1803_v32  ;;  %v1186_v50 = vcombine.low %v924_v31, %v928_v38  ;;  %v547_v56 = vcombine.high %v539_v48, %v539_v48  ;;  %v555_v57 = vrot.slane %v539_v48, %v1799_v24 }
 0x11a   : > { %v1170_v53 = vcombine.low %v916_v45, %v920_v43  ;;  %v1177_v55 = vrot.slane %v1169_v47, %v1805_v33  ;;  %v548_v60 = vcombine.high %v546_v51, %v546_v51  ;;  %v562_v54 = vrot.slane %v546_v51, %v1799_v24 }
 0x11b   : > { %v1187_v58 = vcombine.low %v932_v39, %v936_v49  ;;  %v1194_v59 = vrot.slane %v1186_v50, %v1805_v33  ;;  %v569_v62 = vrot.slane %v547_v56, %v1799_v24  ;;  %v577_v63 = vcombine.high %v555_v57, %v555_v57 }
 0x11c   : > { %v1184_v61 = vrot.slane %v1170_v53, %v1805_v33  ;;  %v876_v0 = vrot.slane %v555_v57, %v1803_v32  ;;  %v576_v2 = vrot.slane %v548_v60, %v1799_v24  ;;  %v578_v3 = vcombine.high %v562_v54, %v562_v54 }
 0x11d   : > { %v1201_v1 = vrot.slane %v1187_v58, %v1805_v33  ;;  %v892_v4 = vrot.slane %v562_v54, %v1803_v32  ;;  %v579_v6 = vcombine.high %v569_v62, %v569_v62  ;;  %v880_v7 = vrot.slane %v569_v62, %v1803_v32 }
 0x11e   : > { %v1185_v5 = vcombine.low %v1177_v55, %v1184_v61  ;;  %v884_v8 = vrot.slane %v577_v63, %v1803_v32  ;;  %v580_v10 = vcombine.high %v576_v2, %v576_v2  ;;  %v896_v11 = vrot.slane %v576_v2, %v1803_v32 }
 0x11f   : > { %v1202_v9 = vcombine.low %v1194_v59, %v1201_v1  ;;  %v900_v12 = vrot.slane %v578_v3, %v1803_v32  ;;  %v888_v13 = vrot.slane %v579_v6, %v1803_v32  ;;  %v1135_v15 = vcombine.low %v876_v0, %v880_v7 }
 0x120   : > { %1337 = vst [vmem:[%s1858_s5 + $0x80] sm:$0xff] %v1185_v5  ;;  %1341 = vst [vmem:[%s1858_s5 + $0xa0] sm:$0xff] %v1185_v5  ;;  %v376_v16 = vsel %vm360_vm7, %v1820_v46, %v368_v52  ;;  %v325_v17 = vadd.f32 %v1795_v14, %v1809_v41  ;;  %v904_v18 = vrot.slane %v580_v10, %v1803_v32 }
 0x121   : > { %1338 = vst [vmem:[%s1858_s5 + $0x88] sm:$0xff] %v1202_v9  ;;  %1342 = vst [vmem:[%s1858_s5 + $0xa8] sm:$0xff] %v1202_v9  ;;  %v1152_v19 = vcombine.low %v892_v4, %v896_v11  ;;  %v728_v20 = vcombine.high %v376_v16, %v376_v16  ;;  %v735_v21 = vrot.slane %v376_v16, %v1799_v24 }
 0x122   : > { %v1136_v44 = vcombine.low %v884_v8, %v888_v13  ;;  %v1143_v22 = vrot.slane %v1135_v15, %v1805_v33  ;;  %vm355_vm8 = vcmp.ge.f32.partialorder %v325_v17, 0.0  ;;  %v363_v23 = vmul.f32 0.1, %v325_v17 }
 0x123   : > { %v1153_v25 = vcombine.low %v900_v12, %v904_v18  ;;  %v1160_v26 = vrot.slane %v1152_v19, %v1805_v33  ;;  %v742_v46 = vrot.slane %v728_v20, %v1799_v24  ;;  %v743_v27 = vcombine.high %v735_v21, %v735_v21 }
 0x124   : > { %v1150_v41 = vrot.slane %v1136_v44, %v1805_v33  ;;  %v751_v28 = vrot.slane %v735_v21, %v1799_v24  ;;  %v371_v29 = vsel %vm355_vm8, %v325_v17, %v363_v23  ;;  %v1948_v30 = vadd.f32 %v1795_v14, %v1811_v42 }
 0x125   : > { %v1167_v31 = vrot.slane %v1153_v25, %v1805_v33  ;;  %v744_v34 = vcombine.high %v742_v46, %v742_v46  ;;  %v758_v35 = vrot.slane %v742_v46, %v1799_v24  ;;  %v765_v36 = vrot.slane %v743_v27, %v1799_v24 }
 0x126   : > { %v1151_v45 = vcombine.low %v1143_v22, %v1150_v41  ;;  %v773_v37 = vcombine.high %v751_v28, %v751_v28  ;;  %v1004_v38 = vrot.slane %v751_v28, %v1803_v32  ;;  %v483_v39 = vcombine.high %v371_v29, %v371_v29 }
 0x127   : > { %v1168_v40 = vcombine.low %v1160_v26, %v1167_v31  ;;  %v772_v43 = vrot.slane %v744_v34, %v1799_v24  ;;  %v774_v47 = vcombine.high %v758_v35, %v758_v35  ;;  %v775_v14 = vcombine.high %v765_v36, %v765_v36 }
 0x128   : > { %1331 = vst [vmem:[%s1858_s5 + $0x50] sm:$0xff] %v1151_v45  ;;  %1335 = vst [vmem:[%s1858_s5 + $0x70] sm:$0xff] %v1151_v45  ;;  %v1008_v42 = vrot.slane %v765_v36, %v1803_v32  ;;  %v1012_v48 = vrot.slane %v773_v37, %v1803_v32  ;;  %v1020_v49 = vrot.slane %v758_v35, %v1803_v32  ;;  %vm359_vm9 = vcmp.ge.f32.partialorder %v1948_v30, 0.0 }
 0x129   : > { %v490_v50 = vrot.slane %v371_v29, %v1799_v24  ;;  %1332 = vst [vmem:[%s1858_s5 + $0x58] sm:$0xff] %v1168_v40  ;;  %1336 = vst [vmem:[%s1858_s5 + $0x78] sm:$0xff] %v1168_v40  ;;  %v776_v51 = vcombine.high %v772_v43, %v772_v43  ;;  %v1016_v52 = vrot.slane %v775_v14, %v1803_v32  ;;  %v367_v21 = vmul.f32 0.1, %v1948_v30 }
 0x12a   : > { %v1024_v53 = vrot.slane %v772_v43, %v1803_v32  ;;  %v1028_v55 = vrot.slane %v774_v47, %v1803_v32  ;;  %v1271_v56 = vcombine.low %v1004_v38, %v1008_v42  ;;  %v497_v57 = vrot.slane %v483_v39, %v1799_v24 }
 0x12b   : > { %v498_v58 = vcombine.high %v490_v50, %v490_v50  ;;  %v506_v59 = vrot.slane %v490_v50, %v1799_v24  ;;  %v1032_v60 = vrot.slane %v776_v51, %v1803_v32  ;;  %v1272_v54 = vcombine.low %v1012_v48, %v1016_v52 }
 0x12c   : > { %v1288_v61 = vcombine.low %v1020_v49, %v1024_v53  ;;  %v1279_v62 = vrot.slane %v1271_v56, %v1805_v33  ;;  %v499_v63 = vcombine.high %v497_v57, %v497_v57  ;;  %v513_v0 = vrot.slane %v497_v57, %v1799_v24 }
 0x12d   : > { %v520_v1 = vrot.slane %v498_v58, %v1799_v24  ;;  %v1286_v2 = vrot.slane %v1272_v54, %v1805_v33  ;;  %v1289_v3 = vcombine.low %v1028_v55, %v1032_v60  ;;  %v528_v5 = vcombine.high %v506_v59, %v506_v59 }
 0x12e   : > { %v1296_v4 = vrot.slane %v1288_v61, %v1805_v33  ;;  %v527_v6 = vrot.slane %v499_v63, %v1799_v24  ;;  %v529_v7 = vcombine.high %v513_v0, %v513_v0  ;;  %v844_v9 = vrot.slane %v506_v59, %v1803_v32 }
 0x12f   : > { %v530_v8 = vcombine.high %v520_v1, %v520_v1  ;;  %v1287_v10 = vcombine.low %v1279_v62, %v1286_v2  ;;  %v1303_v11 = vrot.slane %v1289_v3, %v1805_v33  ;;  %v848_v12 = vrot.slane %v520_v1, %v1803_v32 }
 0x130   : > { %v852_v13 = vrot.slane %v528_v5, %v1803_v32  ;;  %v531_v15 = vcombine.high %v527_v6, %v527_v6  ;;  %v860_v17 = vrot.slane %v513_v0, %v1803_v32  ;;  %v864_v18 = vrot.slane %v527_v6, %v1803_v32 }
 0x131   : > { %v856_v16 = vrot.slane %v530_v8, %v1803_v32  ;;  %v1304_v19 = vcombine.low %v1296_v4, %v1303_v11  ;;  %1347 = vst [vmem:[%s1858_s5 + $0xd0] sm:$0xff] %v1287_v10  ;;  %1351 = vst [vmem:[%s1858_s5 + $0xf0] sm:$0xff] %v1287_v10  ;;  %v1101_v20 = vcombine.low %v844_v9, %v848_v12 }
 0x132   : > { %v868_v44 = vrot.slane %v529_v7, %v1803_v32  ;;  %v872_v22 = vrot.slane %v531_v15, %v1803_v32  ;;  %v1118_v25 = vcombine.low %v860_v17, %v864_v18  ;;  %v375_v26 = vsel %vm359_vm9, %v1948_v30, %v367_v21 }
 0x133   : > { %v1102_v23 = vcombine.low %v852_v13, %v856_v16  ;;  %1348 = vst [vmem:[%s1858_s5 + $0xd8] sm:$0xff] %v1304_v19  ;;  %1352 = vst [vmem:[%s1858_s5 + $0xf8] sm:$0xff] %v1304_v19  ;;  %v1109_v46 = vrot.slane %v1101_v20, %v1805_v33  ;;  %v679_v28 = vcombine.high %v375_v26, %v375_v26 }
 0x134   : > { %v1119_v41 = vcombine.low %v868_v44, %v872_v22  ;;  %v686_v29 = vrot.slane %v375_v26, %v1799_v24  ;;  %v1126_v34 = vrot.slane %v1118_v25, %v1805_v33 }
 0x135   : > { %v1116_v27 = vrot.slane %v1102_v23, %v1805_v33  ;;  %v693_v36 = vrot.slane %v679_v28, %v1799_v24 }
 0x136   : > { %v1133_v35 = vrot.slane %v1119_v41, %v1805_v33  ;;  %v694_v30 = vcombine.high %v686_v29, %v686_v29  ;;  %v702_v45 = vrot.slane %v686_v29, %v1799_v24 }
 0x137   : > { %v1117_v31 = vcombine.low %v1109_v46, %v1116_v27  ;;  %v695_v38 = vcombine.high %v693_v36, %v693_v36  ;;  %v709_v39 = vrot.slane %v693_v36, %v1799_v24 }
 0x138   : > { %v1134_v37 = vcombine.low %v1126_v34, %v1133_v35  ;;  %v716_v40 = vrot.slane %v694_v30, %v1799_v24  ;;  %v724_v43 = vcombine.high %v702_v45, %v702_v45  ;;  %v972_v48 = vrot.slane %v702_v45, %v1803_v32 }
 0x139   : > { %1329 = vst [vmem:[%s1858_s5 + $0x40] sm:$0xff] %v1117_v31  ;;  %1333 = vst [vmem:[%s1858_s5 + $0x60] sm:$0xff] %v1117_v31  ;;  %v723_v47 = vrot.slane %v695_v38, %v1799_v24  ;;  %v725_v14 = vcombine.high %v709_v39, %v709_v39  ;;  %v988_v51 = vrot.slane %v709_v39, %v1803_v32 }
 0x13a   : > { %1330 = vst [vmem:[%s1858_s5 + $0x48] sm:$0xff] %v1134_v37  ;;  %1334 = vst [vmem:[%s1858_s5 + $0x68] sm:$0xff] %v1134_v37  ;;  %v726_v42 = vcombine.high %v716_v40, %v716_v40  ;;  %v976_v49 = vrot.slane %v716_v40, %v1803_v32  ;;  %v980_v53 = vrot.slane %v724_v43, %v1803_v32 }
 0x13b   : > { %v727_v50 = vcombine.high %v723_v47, %v723_v47  ;;  %v992_v52 = vrot.slane %v723_v47, %v1803_v32  ;;  %v996_v24 = vrot.slane %v725_v14, %v1803_v32 }
 0x13c   : > { %v984_v55 = vrot.slane %v726_v42, %v1803_v32  ;;  %v1237_v56 = vcombine.low %v972_v48, %v976_v49 }
 0x13d   : > { %v1000_v57 = vrot.slane %v727_v50, %v1803_v32  ;;  %v1254_v58 = vcombine.low %v988_v51, %v992_v52 }
 0x13e   : > { %v1238_v59 = vcombine.low %v980_v53, %v984_v55  ;;  %v1245_v54 = vrot.slane %v1237_v56, %v1805_v33 }
 0x13f   : > { %v1255_v60 = vcombine.low %v996_v24, %v1000_v57  ;;  %v1262_v62 = vrot.slane %v1254_v58, %v1805_v33 }
 0x140   : > { %v1252_v61 = vrot.slane %v1238_v59, %v1805_v33 }
 0x141   : > { %v1269_v63 = vrot.slane %v1255_v60, %v1805_v33 }
 0x142   : > { %v1253_v0 = vcombine.low %v1245_v54, %v1252_v61 }
 0x143   : > { %v1270_v32 = vcombine.low %v1262_v62, %v1269_v63 }
 0x144   : > { %1345 = vst [vmem:[%s1858_s5 + $0xc0] sm:$0xff] %v1253_v0  ;;  %1349 = vst [vmem:[%s1858_s5 + $0xe0] sm:$0xff] %v1253_v0 }
 0x145   : > { %1346 = vst [vmem:[%s1858_s5 + $0xc8] sm:$0xff] %v1270_v32  ;;  %1350 = vst [vmem:[%s1858_s5 + $0xe8] sm:$0xff] %v1270_v32 }
 0x146   : > { %1596 = shalt.err (!%p1593_p7)
}
 0x147   : > { %s1597_s29 = scalar_lea.hbm %s2025_s11, 4096  ;;  %s1601_s6 = scalar_lea.hbm %s2090_s3, 32768 }
 0x148   : > { %p1598_p9 = scmp.ne.s32.totalorder %s2025_s11, %s1597_s29  ;;  %p1602_p12 = scmp.lt.u32.totalorder %s2025_s11, %s2090_s3 }
 0x149   : > { %p1603_p13 = scmp.lt.u32.totalorder %s1601_s6, %s1597_s29  ;;  %p1605_p1 = scmp.lt.u32.totalorder %s1597_s29, %s2025_s11 }
 0x14a   : > { %p1599_p10 = pnand %p1598_p9, %p1755_p3 }
 0x14b   : > { %p1604_p0 = por %p1603_p13, %p1602_p12 }
 0x14c   : > { %p1600_p11 = pneg %p1599_p10 }
 0x14d   : > { %p1606_p2 = por %p1605_p1, %p1604_p0 }
 0x14f   : > { %p1607_p4 = pnand %p1606_p2, %p1600_p11 }
 0x151   : > { %1610 = shalt.err (!%p1607_p4)
}
 0x152   : > { %s1682_s15 = smov 128   ;;  %s1683_s9 = smov 8  }
 0x153   : > { %1508 = dma.vmem_to_hbm [thread:$0]  (%p1755_p3), %s2027_s16, 4096, %s2025_s11, %s2035_s20, %s1682_s15, %s1682_s15, %s1683_s9  }
 0x154 PF: > { %p1514_p5 = scmp.ge.s32.totalorder %s1677_s19, 2  ;;  %s1385_s10 = sand.u32 1, %s1649_s12  }
 0x155   : > { %s1386_s21 = scalar_lea.sflag [#allocation3], %s1385_s10 }
 0x156   : > { %p1511_p6 = pnand %p1514_p5, %p1764_p8 }
 0x158   : > { %1644 = dma.done.wait (!%p1511_p6), %s1386_s21, 4096  }
 0x159   : > { %1646 = vsyncadd (!%p1511_p6), %s1386_s21, 4294963200  ;;  %s16_s19 = sadd.s32 1, %s1677_s19   ;;  %s2093_s12 = smov %s1653_s13 }
 0x15a   : > { %p13_p7 = scmp.ge.s32.totalorder %s16_s19, 10   ;;  %s2094_s13 = smov %s1657_s14 }
 0x15b   : > { %s2095_s14 = smov %s1773_s30  ;;  %s2096_s15 = smov %s1669_s17 }
 0x15c   : > { %s2097_s16 = smov %s1673_s18  ;;  %s2098_s17 = smov %s2101_s22 }
 0x15d   : > { %s2099_s18 = smov %s2105_s23  ;;  %15 = sbr.rel (!%p13_p7) target bundleno = 5 (0x5), region = 67 }
 0x164   :  { %1391 = vsyncpa [#allocation3], 1 }
 0x165   :  { %1393 = vsyncpa [#allocation3 + $0x1], 1 }

</bundles_post_ra>
